<compile_context>
chip_gen: v7x
topology: tpu7x:2x2x1
jax: 0.10.0
libtpu: 0.0.40
codegen_flags: <defaults>
</compile_context>

<pallas_src>
import functools
import math

import jax
import jax.numpy as jnp
from jax.experimental import pallas as pl
from jax.experimental.pallas import tpu as pltpu


_EPS_SQ = 1e-24  # (F.normalize eps=1e-12)^2, applied to the squared norm


def _row_sce_terms(x, y, gamma):
    """Per-row (1 - cos(x_i, y_i))**gamma, shape [rows, 1].  rsqrt-based."""
    inv_x = jax.lax.rsqrt(jnp.maximum(jnp.sum(x * x, axis=-1, keepdims=True), _EPS_SQ))
    inv_y = jax.lax.rsqrt(jnp.maximum(jnp.sum(y * y, axis=-1, keepdims=True), _EPS_SQ))
    cos = jnp.sum((x * inv_x) * (y * inv_y), axis=-1, keepdims=True)
    base = 1.0 - cos
    if gamma == 2.0:
        return base * base                       # VPU only, matches (1-cos)^2 exactly
    # TODO(synk): non-integer gamma on a (rare) negative base is clamped to 0.
    return jnp.power(jnp.maximum(base, 0.0), gamma)


# --------------------- kernel 1: fused attribute path -----------------------
# masked MLP-autoencoder + weighted SCE + unmasked encoder embedding.
# Grid over row tiles; the scalar loss output is resident across the row axis.

def _feat_kernel(x_ref, keep_ref,                  # [tm, D], [tm, 1]
                 w1_ref, b1_ref,                   # enc fc1
                 w2_ref, b2_ref,                   # enc fc2 folded with e2d
                 dw1_ref, db1_ref,                 # dec fc1
                 dw2_ref, db2_ref,                 # dec fc2
                 emb_ref, loss_ref,                # outputs: [tm, H], [1, 1]
                 *, gamma, inv_num_mask):
    i = pl.program_id(0)

    x = x_ref[...]
    keep = keep_ref[...]

    # ---- unmasked encoder path (embeddings also reused for edge recon) ----
    h1 = jnp.maximum(
        jnp.dot(x, w1_ref[...], preferred_element_type=jnp.float32) + b1_ref[...], 0.0)
    emb = jnp.dot(h1, w2_ref[...], preferred_element_type=jnp.float32) + b2_ref[...]
    emb_ref[...] = emb.astype(emb_ref.dtype)

    # ---- masked attribute-reconstruction path (all in VMEM) ----
    # hidden_rep == emb * keep exactly (row-wise MLP encoder + re-masking),
    # so the masked encoder matmuls are skipped.
    hid = emb * keep
    d1 = jnp.maximum(
        jnp.dot(hid, dw1_ref[...], preferred_element_type=jnp.float32) + db1_ref[...],
        0.0)
    dec = jnp.dot(d1, dw2_ref[...], preferred_element_type=jnp.float32) + db2_ref[...]

    # ---- SCE over masked rows only: weight rows by (1 - keep) ----
    loss_row = _row_sce_terms(x, dec, gamma)
    tile_sum = jnp.sum(loss_row * (1.0 - keep), keepdims=True)       # (1, 1)

    @pl.when(i == 0)
    def _():
        loss_ref[...] = jnp.zeros_like(loss_ref)

    loss_ref[...] += tile_sum

    @pl.when(i == pl.num_programs(0) - 1)
    def _():
        loss_ref[...] = loss_ref[...] * inv_num_mask


def fused_attribute_and_encoder(params, x, keep, num_mask, gamma, tm):
    N, D = x.shape
    Hh = params["enc_w1"].shape[1]       # 2 * D
    H = params["enc_w2e2d"].shape[1]     # hidden
    DH = params["dec_w1"].shape[1]       # 2 * hidden
    assert N % tm == 0, "row count must be a multiple of the row tile"
    # TODO(synk): pad N to a multiple of tm (with zero keep-weight) for general N.

    inv_nm = 1.0 / float(max(int(num_mask), 1))
    keep2 = keep.reshape(N, 1).astype(jnp.float32)

    emb, loss = pl.pallas_call(
        functools.partial(_feat_kernel, gamma=float(gamma), inv_num_mask=inv_nm),
        out_shape=(jax.ShapeDtypeStruct((N, H), jnp.float32),
                   jax.ShapeDtypeStruct((1, 1), jnp.float32)),
        grid=(N // tm,),
        in_specs=[
            pl.BlockSpec((tm, D), lambda i: (i, 0)),             # x rows
            pl.BlockSpec((tm, 1), lambda i: (i, 0)),             # keep rows
            pl.BlockSpec((D, Hh), lambda i: (0, 0)),             # enc_w1 (resident)
            pl.BlockSpec((1, Hh), lambda i: (0, 0)),
            pl.BlockSpec((Hh, H), lambda i: (0, 0)),             # enc_w2 @ e2d (folded)
            pl.BlockSpec((1, H), lambda i: (0, 0)),
            pl.BlockSpec((H, DH), lambda i: (0, 0)),             # dec_w1
            pl.BlockSpec((1, DH), lambda i: (0, 0)),
            pl.BlockSpec((DH, D), lambda i: (0, 0)),             # dec_w2
            pl.BlockSpec((1, D), lambda i: (0, 0)),
        ],
        out_specs=(pl.BlockSpec((tm, H), lambda i: (i, 0)),
                   pl.BlockSpec((1, 1), lambda i: (0, 0))),      # resident accumulator
        compiler_params=pltpu.CompilerParams(
            dimension_semantics=("arbitrary",)),
    )(x.astype(jnp.float32), keep2,
      params["enc_w1"], params["enc_b1"].reshape(1, -1),
      params["enc_w2e2d"], params["enc_b2e2d"].reshape(1, -1),
      params["dec_w1"], params["dec_b1"].reshape(1, -1),
      params["dec_w2"], params["dec_b2"].reshape(1, -1))
    return emb, loss[0, 0]


# --------------------- kernel 2: fused edge-reconstruction loss -------------
# recon_adj = emb @ emb.T is computed tile-by-tile and consumed immediately by
# the per-row SCE reduction; it never touches HBM.

def _edge_kernel(adj_ref, emb_row_ref, emb_all_ref, loss_ref, *, gamma, inv_rows):
    i = pl.program_id(0)

    adj = adj_ref[...]                  # [tm, N]
    er = emb_row_ref[...]               # [tm, H]
    ea = emb_all_ref[...]               # [N, H]  (resident)

    recon = jax.lax.dot_general(        # [tm, N] = er @ ea.T
        er, ea,
        dimension_numbers=(((1,), (1,)), ((), ())),
        preferred_element_type=jnp.float32)

    loss_row = _row_sce_terms(adj, recon, gamma)
    tile_sum = jnp.sum(loss_row, keepdims=True)                   # (1, 1)

    @pl.when(i == 0)
    def _():
        loss_ref[...] = jnp.zeros_like(loss_ref)

    loss_ref[...] += tile_sum

    @pl.when(i == pl.num_programs(0) - 1)
    def _():
        loss_ref[...] = loss_ref[...] * inv_rows


def fused_edge_loss(adj, emb, gamma, tm):
    N, H = emb.shape
    assert adj.shape == (N, N)
    assert N % tm == 0

    out = pl.pallas_call(
        functools.partial(_edge_kernel, gamma=float(gamma), inv_rows=1.0 / float(N)),
        out_shape=jax.ShapeDtypeStruct((1, 1), jnp.float32),
        grid=(N // tm,),
        in_specs=[
            pl.BlockSpec((tm, N), lambda i: (i, 0)),   # adj row tile
            pl.BlockSpec((tm, H), lambda i: (i, 0)),   # emb row tile
            pl.BlockSpec((N, H), lambda i: (0, 0)),    # full emb (resident)
        ],
        out_specs=pl.BlockSpec((1, 1), lambda i: (0, 0)),
        compiler_params=pltpu.CompilerParams(
            dimension_semantics=("arbitrary",)),
    )(adj.astype(jnp.float32), emb, emb)
    return out[0, 0]


# --------------------------- model (glue in JAX) ----------------------------

def init_linear(key, fan_in, fan_out, bias=True):
    kw, kb = jax.random.split(key)
    bound = 1.0 / math.sqrt(fan_in)
    w = jax.random.uniform(kw, (fan_in, fan_out), jnp.float32, -bound, bound)
    if not bias:
        return w, None
    b = jax.random.uniform(kb, (fan_out,), jnp.float32, -bound, bound)
    return w, b


def fold_encoder_to_decoder(params):
    """enc fc2 and encoder_to_decoder are back-to-back linears with no
    nonlinearity: fold them once (one tiny host-side matmul)."""
    params["enc_w2e2d"] = jnp.dot(params["enc_w2"], params["e2d_w"])
    params["enc_b2e2d"] = jnp.dot(params["enc_b2"], params["e2d_w"])
    return params


def hgarme_forward(params, x_target, adj, keep_mask, num_mask, gamma, tm=16):
    # ---------------- mask_attribute_reconstruction (one fused kernel) ------
    # also returns emb = encoder_to_decoder(MLP_enc(x)) for the edge path.
    emb, feat_loss = fused_attribute_and_encoder(
        params, x_target, keep_mask, num_mask, gamma, tm)
    # ---------------- mask_edge_reconstruction (one fused kernel) -----------
    edge_loss = fused_edge_loss(adj, emb, gamma, tm)
    return feat_loss, edge_loss


# ---------------- literal pure-JAX reference (for self-verification) --------

def reference_forward(params, x, adj, keep_mask, num_mask, gamma):
    hp = jax.lax.Precision.HIGHEST
    dot = lambda a, b: jnp.dot(a, b, precision=hp)
    keep2 = keep_mask.reshape(-1, 1)

    def sce_rows(a, b):
        an = a / jnp.maximum(jnp.linalg.norm(a, axis=-1, keepdims=True), 1e-12)
        bn = b / jnp.maximum(jnp.linalg.norm(b, axis=-1, keepdims=True), 1e-12)
        return (1.0 - jnp.sum(an * bn, axis=-1)) ** gamma

    # literal masked attribute path (mask x -> enc -> e2d -> re-mask -> dec)
    mx = x * keep2
    h1 = jax.nn.relu(dot(mx, params["enc_w1"]) + params["enc_b1"])
    enc = dot(h1, params["enc_w2"]) + params["enc_b2"]
    hid = dot(enc, params["e2d_w"]) * keep2
    d1 = jax.nn.relu(dot(hid, params["dec_w1"]) + params["dec_b1"])
    dec = dot(d1, params["dec_w2"]) + params["dec_b2"]
    feat = jnp.sum(sce_rows(x, dec) * (1.0 - keep_mask)) / max(int(num_mask), 1)

    # edge path (unmasked encoder -> e2d -> emb @ emb.T)
    h1u = jax.nn.relu(dot(x, params["enc_w1"]) + params["enc_b1"])
    emb = dot(dot(h1u, params["enc_w2"]) + params["enc_b2"], params["e2d_w"])
    edge = jnp.mean(sce_rows(adj, dot(emb, emb.T)))
    return feat, edge


if __name__ == "__main__":
    # --- small, forward-consistent shapes ---
    N_PAPER = 32          # target-type nodes
    N_AUTHOR = 24         # second node type (unused: all_*_recons = False)
    IN_DIM = {"paper": 32, "author": 16}   # ntype_in_dim ; target_in_dim = 32
    HIDDEN = 32           # args.num_hidden  (encoder/decoder = 'MLP' -> enc_dim = hidden)
    MASK_RATE = 0.5       # args.mask_rate
    GAMMA = 2.0           # args.gamma
    ROW_TILE = 16         # exercises the multi-tile accumulation path (32 / 16 = 2)

    key = jax.random.PRNGKey(0)
    keys = jax.random.split(key, 12)

    params = {}
    # encoder = MultiLayerPerception(target_in_dim, enc_dim)
    params["enc_w1"], params["enc_b1"] = init_linear(keys[0], IN_DIM["paper"], 2 * IN_DIM["paper"])
    params["enc_w2"], params["enc_b2"] = init_linear(keys[1], 2 * IN_DIM["paper"], HIDDEN)
    # encoder_to_decoder = Linear(hidden, hidden, bias=False)
    params["e2d_w"], _ = init_linear(keys[2], HIDDEN, HIDDEN, bias=False)
    # decoder = MultiLayerPerception(dec_in_dim, target_in_dim)
    params["dec_w1"], params["dec_b1"] = init_linear(keys[3], HIDDEN, 2 * HIDDEN)
    params["dec_w2"], params["dec_b2"] = init_linear(keys[4], 2 * HIDDEN, IN_DIM["paper"])
    # weight_T / mask tokens exist in __init__ (used only by unprovided graph encoders)
    params["weight_T_paper"], params["weight_T_paper_b"] = init_linear(keys[5], IN_DIM["paper"], HIDDEN)
    params["weight_T_author"], params["weight_T_author_b"] = init_linear(keys[6], IN_DIM["author"], HIDDEN)
    params["mask_token_paper"] = jnp.zeros((1, IN_DIM["paper"]), jnp.float32)
    params["mask_token_author"] = jnp.zeros((1, IN_DIM["author"]), jnp.float32)

    params = fold_encoder_to_decoder(params)

    # deterministic example inputs
    x_paper = jax.random.normal(keys[7], (N_PAPER, IN_DIM["paper"]), jnp.float32)
    _x_author = jax.random.normal(keys[8], (N_AUTHOR, IN_DIM["author"]), jnp.float32)  # unused
    adj = (jax.random.uniform(keys[9], (N_PAPER, N_PAPER)) < 0.2).astype(jnp.float32)

    # deterministic stand-in for torch.randperm-based masking (host glue)
    num_mask = int(MASK_RATE * N_PAPER)
    perm = jax.random.permutation(keys[10], N_PAPER)
    mask_nodes = perm[:num_mask]
    keep_mask = jnp.ones((N_PAPER,), jnp.float32).at[mask_nodes].set(0.0)

    feat_loss, edge_loss = hgarme_forward(
        params, x_paper, adj, keep_mask, num_mask, GAMMA, tm=ROW_TILE)
    jax.block_until_ready((feat_loss, edge_loss))
    assert jnp.isfinite(feat_loss) and jnp.isfinite(edge_loss)

    # self-verification against the literal (un-fused) forward path
    feat_ref, edge_ref = reference_forward(
        params, x_paper, adj, keep_mask, num_mask, GAMMA)
    assert jnp.allclose(feat_loss, feat_ref, rtol=3e-2, atol=3e-2), (feat_loss, feat_ref)
    assert jnp.allclose(edge_loss, edge_ref, rtol=3e-2, atol=3e-2), (edge_loss, edge_ref)

    print("KERNEL_OK")
</pallas_src>

<mosaic_0001>
module attributes {stable_mosaic.version = 11 : i64} {
  func.func @_feat_kernel(%arg0: i32, %arg1: memref<16x32xf32, #tpu.memory_space<vmem>>, %arg2: memref<16x1xf32, #tpu.memory_space<vmem>>, %arg3: memref<32x64xf32, #tpu.memory_space<vmem>>, %arg4: memref<1x64xf32, #tpu.memory_space<vmem>>, %arg5: memref<64x32xf32, #tpu.memory_space<vmem>>, %arg6: memref<1x32xf32, #tpu.memory_space<vmem>>, %arg7: memref<32x64xf32, #tpu.memory_space<vmem>>, %arg8: memref<1x64xf32, #tpu.memory_space<vmem>>, %arg9: memref<64x32xf32, #tpu.memory_space<vmem>>, %arg10: memref<1x32xf32, #tpu.memory_space<vmem>>, %arg11: memref<16x32xf32, #tpu.memory_space<vmem>>, %arg12: memref<1x1xf32, #tpu.memory_space<vmem>>) attributes {dimension_semantics = [#tpu.dimension_semantics<arbitrary>], iteration_bounds = array<i64: 2>, scalar_prefetch = 0 : i64, scratch_operands = 0 : i64, tpu.core_type = #tpu.core_type<tc>, window_params = [{transform_indices = @transform_0, window_bounds = array<i64: 16, 32>}, {transform_indices = @transform_1, window_bounds = array<i64: 16, 1>}, {pipeline_mode = #tpu.pipeline_mode<synchronous>, transform_indices = @transform_2, window_bounds = array<i64: 32, 64>}, {pipeline_mode = #tpu.pipeline_mode<synchronous>, transform_indices = @transform_3, window_bounds = array<i64: 1, 64>}, {pipeline_mode = #tpu.pipeline_mode<synchronous>, transform_indices = @transform_4, window_bounds = array<i64: 64, 32>}, {pipeline_mode = #tpu.pipeline_mode<synchronous>, transform_indices = @transform_5, window_bounds = array<i64: 1, 32>}, {pipeline_mode = #tpu.pipeline_mode<synchronous>, transform_indices = @transform_6, window_bounds = array<i64: 32, 64>}, {pipeline_mode = #tpu.pipeline_mode<synchronous>, transform_indices = @transform_7, window_bounds = array<i64: 1, 64>}, {pipeline_mode = #tpu.pipeline_mode<synchronous>, transform_indices = @transform_8, window_bounds = array<i64: 64, 32>}, {pipeline_mode = #tpu.pipeline_mode<synchronous>, transform_indices = @transform_9, window_bounds = array<i64: 1, 32>}, {transform_indices = @transform_10, window_bounds = array<i64: 16, 32>}, {pipeline_mode = #tpu.pipeline_mode<synchronous>, transform_indices = @transform_11, window_bounds = array<i64: 1, 1>}]} {
    %c0 = arith.constant 0 : index
    %c0_0 = arith.constant 0 : index
    %0 = vector.load %arg1[%c0, %c0_0] : memref<16x32xf32, #tpu.memory_space<vmem>>, vector<16x32xf32>
    %c0_1 = arith.constant 0 : index
    %c0_2 = arith.constant 0 : index
    %1 = vector.load %arg2[%c0_1, %c0_2] : memref<16x1xf32, #tpu.memory_space<vmem>>, vector<16x1xf32>
    %c0_3 = arith.constant 0 : index
    %c0_4 = arith.constant 0 : index
    %2 = vector.load %arg3[%c0_3, %c0_4] : memref<32x64xf32, #tpu.memory_space<vmem>>, vector<32x64xf32>
    %cst = arith.constant dense<0.000000e+00> : vector<16x64xf32>
    %3 = tpu.matmul %0, %2, %cst {dimension_numbers = #tpu.dot_dimension_numbers<[1], [0], [0], [1], [0, 0, 1, 1], [], []>} : vector<16x32xf32>, vector<32x64xf32>, vector<16x64xf32> -> vector<16x64xf32>
    %c0_5 = arith.constant 0 : index
    %c0_6 = arith.constant 0 : index
    %4 = vector.load %arg4[%c0_5, %c0_6] : memref<1x64xf32, #tpu.memory_space<vmem>>, vector<1x64xf32>
    %5 = vector.broadcast %4 : vector<1x64xf32> to vector<16x64xf32>
    %6 = arith.addf %3, %5 : vector<16x64xf32>
    %cst_7 = arith.constant 0.000000e+00 : f32
    %7 = vector.broadcast %cst_7 : f32 to vector<16x64xf32>
    %8 = arith.maximumf %6, %7 : vector<16x64xf32>
    %c0_8 = arith.constant 0 : index
    %c0_9 = arith.constant 0 : index
    %9 = vector.load %arg5[%c0_8, %c0_9] : memref<64x32xf32, #tpu.memory_space<vmem>>, vector<64x32xf32>
    %cst_10 = arith.constant dense<0.000000e+00> : vector<16x32xf32>
    %10 = tpu.matmul %8, %9, %cst_10 {dimension_numbers = #tpu.dot_dimension_numbers<[1], [0], [0], [1], [0, 0, 1, 1], [], []>} : vector<16x64xf32>, vector<64x32xf32>, vector<16x32xf32> -> vector<16x32xf32>
    %c0_11 = arith.constant 0 : index
    %c0_12 = arith.constant 0 : index
    %11 = vector.load %arg6[%c0_11, %c0_12] : memref<1x32xf32, #tpu.memory_space<vmem>>, vector<1x32xf32>
    %12 = vector.broadcast %11 : vector<1x32xf32> to vector<16x32xf32>
    %13 = arith.addf %10, %12 : vector<16x32xf32>
    %c0_13 = arith.constant 0 : index
    %c0_14 = arith.constant 0 : index
    %14 = vector.load %arg11[%c0_13, %c0_14] : memref<16x32xf32, #tpu.memory_space<vmem>>, vector<16x32xf32>
    tpu.vector_store %arg11[%c0_13, %c0_14], %13 {strides = array<i32>} : memref<16x32xf32, #tpu.memory_space<vmem>>, vector<16x32xf32>,
    %15 = vector.broadcast %1 : vector<16x1xf32> to vector<16x32xf32>
    %16 = arith.mulf %13, %15 : vector<16x32xf32>
    %c0_15 = arith.constant 0 : index
    %c0_16 = arith.constant 0 : index
    %17 = vector.load %arg7[%c0_15, %c0_16] : memref<32x64xf32, #tpu.memory_space<vmem>>, vector<32x64xf32>
    %cst_17 = arith.constant dense<0.000000e+00> : vector<16x64xf32>
    %18 = tpu.matmul %16, %17, %cst_17 {dimension_numbers = #tpu.dot_dimension_numbers<[1], [0], [0], [1], [0, 0, 1, 1], [], []>} : vector<16x32xf32>, vector<32x64xf32>, vector<16x64xf32> -> vector<16x64xf32>
    %c0_18 = arith.constant 0 : index
    %c0_19 = arith.constant 0 : index
    %19 = vector.load %arg8[%c0_18, %c0_19] : memref<1x64xf32, #tpu.memory_space<vmem>>, vector<1x64xf32>
    %20 = vector.broadcast %19 : vector<1x64xf32> to vector<16x64xf32>
    %21 = arith.addf %18, %20 : vector<16x64xf32>
    %cst_20 = arith.constant 0.000000e+00 : f32
    %22 = vector.broadcast %cst_20 : f32 to vector<16x64xf32>
    %23 = arith.maximumf %21, %22 : vector<16x64xf32>
    %c0_21 = arith.constant 0 : index
    %c0_22 = arith.constant 0 : index
    %24 = vector.load %arg9[%c0_21, %c0_22] : memref<64x32xf32, #tpu.memory_space<vmem>>, vector<64x32xf32>
    %cst_23 = arith.constant dense<0.000000e+00> : vector<16x32xf32>
    %25 = tpu.matmul %23, %24, %cst_23 {dimension_numbers = #tpu.dot_dimension_numbers<[1], [0], [0], [1], [0, 0, 1, 1], [], []>} : vector<16x64xf32>, vector<64x32xf32>, vector<16x32xf32> -> vector<16x32xf32>
    %c0_24 = arith.constant 0 : index
    %c0_25 = arith.constant 0 : index
    %26 = vector.load %arg10[%c0_24, %c0_25] : memref<1x32xf32, #tpu.memory_space<vmem>>, vector<1x32xf32>
    %27 = vector.broadcast %26 : vector<1x32xf32> to vector<16x32xf32>
    %28 = arith.addf %25, %27 : vector<16x32xf32>
    %29 = arith.mulf %0, %0 : vector<16x32xf32>
    %cst_26 = arith.constant dense<0.000000e+00> : vector<16xf32>
    %30 = vector.multi_reduction <add>, %29, %cst_26 [1] : vector<16x32xf32> to vector<16xf32>
    %31 = vector.shape_cast %30 : vector<16xf32> to vector<16x1xf32>
    %cst_27 = arith.constant 1.000000e-24 : f32
    %32 = vector.broadcast %cst_27 : f32 to vector<16x1xf32>
    %33 = arith.maximumf %31, %32 : vector<16x1xf32>
    %34 = math.rsqrt %33 : vector<16x1xf32>
    %35 = arith.mulf %28, %28 : vector<16x32xf32>
    %cst_28 = arith.constant dense<0.000000e+00> : vector<16xf32>
    %36 = vector.multi_reduction <add>, %35, %cst_28 [1] : vector<16x32xf32> to vector<16xf32>
    %37 = vector.shape_cast %36 : vector<16xf32> to vector<16x1xf32>
    %cst_29 = arith.constant 1.000000e-24 : f32
    %38 = vector.broadcast %cst_29 : f32 to vector<16x1xf32>
    %39 = arith.maximumf %37, %38 : vector<16x1xf32>
    %40 = math.rsqrt %39 : vector<16x1xf32>
    %41 = vector.broadcast %34 : vector<16x1xf32> to vector<16x32xf32>
    %42 = arith.mulf %0, %41 : vector<16x32xf32>
    %43 = vector.broadcast %40 : vector<16x1xf32> to vector<16x32xf32>
    %44 = arith.mulf %28, %43 : vector<16x32xf32>
    %45 = arith.mulf %42, %44 : vector<16x32xf32>
    %cst_30 = arith.constant dense<0.000000e+00> : vector<16xf32>
    %46 = vector.multi_reduction <add>, %45, %cst_30 [1] : vector<16x32xf32> to vector<16xf32>
    %47 = vector.shape_cast %46 : vector<16xf32> to vector<16x1xf32>
    %cst_31 = arith.constant 1.000000e+00 : f32
    %48 = vector.broadcast %cst_31 : f32 to vector<16x1xf32>
    %49 = arith.subf %48, %47 : vector<16x1xf32>
    %50 = arith.mulf %49, %49 : vector<16x1xf32>
    %cst_32 = arith.constant 1.000000e+00 : f32
    %51 = vector.broadcast %cst_32 : f32 to vector<16x1xf32>
    %52 = arith.subf %51, %1 : vector<16x1xf32>
    %53 = arith.mulf %50, %52 : vector<16x1xf32>
    %54 = vector.shape_cast %53 : vector<16x1xf32> to vector<1x16x1xf32>
    %cst_33 = arith.constant dense<0.000000e+00> : vector<1xf32>
    %55 = vector.multi_reduction <add>, %54, %cst_33 [1, 2] : vector<1x16x1xf32> to vector<1xf32>
    %56 = vector.shape_cast %55 : vector<1xf32> to vector<1x1x1xf32>
    %57 = vector.extract %56[0, 0, 0] : f32 from vector<1x1x1xf32>
    %58 = vector.broadcast %57 : f32 to vector<1x1xf32>
    %c0_i32 = arith.constant 0 : i32
    %59 = arith.cmpi eq, %arg0, %c0_i32 : i32
    %60 = arith.extui %59 : i1 to i32
    %c0_i32_34 = arith.constant 0 : i32
    %61 = arith.cmpi ne, %60, %c0_i32_34 : i32
    scf.if %61 {
      %cst_40 = arith.constant 0.000000e+00 : f32
      %68 = vector.broadcast %cst_40 : f32 to vector<1x1xf32>
      %c0_41 = arith.constant 0 : index
      %c0_42 = arith.constant 0 : index
      %69 = vector.load %arg12[%c0_41, %c0_42] : memref<1x1xf32, #tpu.memory_space<vmem>>, vector<1x1xf32>
      tpu.vector_store %arg12[%c0_41, %c0_42], %68 {strides = array<i32>} : memref<1x1xf32, #tpu.memory_space<vmem>>, vector<1x1xf32>,
    } else {
    }
    %c0_35 = arith.constant 0 : index
    %c0_36 = arith.constant 0 : index
    %62 = vector.load %arg12[%c0_35, %c0_36] : memref<1x1xf32, #tpu.memory_space<vmem>>, vector<1x1xf32>
    %63 = arith.addf %62, %58 : vector<1x1xf32>
    %c0_37 = arith.constant 0 : index
    %c0_38 = arith.constant 0 : index
    %64 = vector.load %arg12[%c0_37, %c0_38] : memref<1x1xf32, #tpu.memory_space<vmem>>, vector<1x1xf32>
    tpu.vector_store %arg12[%c0_37, %c0_38], %63 {strides = array<i32>} : memref<1x1xf32, #tpu.memory_space<vmem>>, vector<1x1xf32>,
    %c1_i32 = arith.constant 1 : i32
    %65 = arith.cmpi eq, %arg0, %c1_i32 : i32
    %66 = arith.extui %65 : i1 to i32
    %c0_i32_39 = arith.constant 0 : i32
    %67 = arith.cmpi ne, %66, %c0_i32_39 : i32
    scf.if %67 {
      %c0_40 = arith.constant 0 : index
      %c0_41 = arith.constant 0 : index
      %68 = vector.load %arg12[%c0_40, %c0_41] : memref<1x1xf32, #tpu.memory_space<vmem>>, vector<1x1xf32>
      %cst_42 = arith.constant 6.250000e-02 : f32
      %69 = vector.broadcast %cst_42 : f32 to vector<1x1xf32>
      %70 = arith.mulf %68, %69 : vector<1x1xf32>
      %c0_43 = arith.constant 0 : index
      %c0_44 = arith.constant 0 : index
      %71 = vector.load %arg12[%c0_43, %c0_44] : memref<1x1xf32, #tpu.memory_space<vmem>>, vector<1x1xf32>
      tpu.vector_store %arg12[%c0_43, %c0_44], %70 {strides = array<i32>} : memref<1x1xf32, #tpu.memory_space<vmem>>, vector<1x1xf32>,
    } else {
    }
    return
  }
  func.func @transform_0(%arg0: i32) -> (i32, i32) {
    %c0_i32 = arith.constant 0 : i32
    %c0_i32_0 = arith.constant 0 : i32
    return %arg0, %c0_i32 : i32, i32
  }
  func.func @transform_1(%arg0: i32) -> (i32, i32) {
    %c0_i32 = arith.constant 0 : i32
    %c0_i32_0 = arith.constant 0 : i32
    return %arg0, %c0_i32 : i32, i32
  }
  func.func @transform_2(%arg0: i32) -> (i32, i32) {
    %c0_i32 = arith.constant 0 : i32
    %c0_i32_0 = arith.constant 0 : i32
    %c0_i32_1 = arith.constant 0 : i32
    return %c0_i32, %c0_i32_0 : i32, i32
  }
  func.func @transform_3(%arg0: i32) -> (i32, i32) {
    %c0_i32 = arith.constant 0 : i32
    %c0_i32_0 = arith.constant 0 : i32
    %c0_i32_1 = arith.constant 0 : i32
    return %c0_i32, %c0_i32_0 : i32, i32
  }
  func.func @transform_4(%arg0: i32) -> (i32, i32) {
    %c0_i32 = arith.constant 0 : i32
    %c0_i32_0 = arith.constant 0 : i32
    %c0_i32_1 = arith.constant 0 : i32
    return %c0_i32, %c0_i32_0 : i32, i32
  }
  func.func @transform_5(%arg0: i32) -> (i32, i32) {
    %c0_i32 = arith.constant 0 : i32
    %c0_i32_0 = arith.constant 0 : i32
    %c0_i32_1 = arith.constant 0 : i32
    return %c0_i32, %c0_i32_0 : i32, i32
  }
  func.func @transform_6(%arg0: i32) -> (i32, i32) {
    %c0_i32 = arith.constant 0 : i32
    %c0_i32_0 = arith.constant 0 : i32
    %c0_i32_1 = arith.constant 0 : i32
    return %c0_i32, %c0_i32_0 : i32, i32
  }
  func.func @transform_7(%arg0: i32) -> (i32, i32) {
    %c0_i32 = arith.constant 0 : i32
    %c0_i32_0 = arith.constant 0 : i32
    %c0_i32_1 = arith.constant 0 : i32
    return %c0_i32, %c0_i32_0 : i32, i32
  }
  func.func @transform_8(%arg0: i32) -> (i32, i32) {
    %c0_i32 = arith.constant 0 : i32
    %c0_i32_0 = arith.constant 0 : i32
    %c0_i32_1 = arith.constant 0 : i32
    return %c0_i32, %c0_i32_0 : i32, i32
  }
  func.func @transform_9(%arg0: i32) -> (i32, i32) {
    %c0_i32 = arith.constant 0 : i32
    %c0_i32_0 = arith.constant 0 : i32
    %c0_i32_1 = arith.constant 0 : i32
    return %c0_i32, %c0_i32_0 : i32, i32
  }
  func.func @transform_10(%arg0: i32) -> (i32, i32) {
    %c0_i32 = arith.constant 0 : i32
    %c0_i32_0 = arith.constant 0 : i32
    return %arg0, %c0_i32 : i32, i32
  }
  func.func @transform_11(%arg0: i32) -> (i32, i32) {
    %c0_i32 = arith.constant 0 : i32
    %c0_i32_0 = arith.constant 0 : i32
    %c0_i32_1 = arith.constant 0 : i32
    return %c0_i32, %c0_i32_0 : i32, i32
  }
}

</mosaic_0001>

<bundles_post_ra>
// kernel: tpu_custom_call.1
= control target key start
LH: loop header
LB: loop body
LE: loop exit
PB: predicated region body
PF: predicated region fallthrough
CT: control target
= control target key end

     0   :  { %17 = vsyncpa [#allocation3], 0  ;;  %s1649_s0 = inlined_call_operand.vmem [shape: f32[32,32], index: 0, kind: input, shape index: {}]   ;;  %s1650_s1 = inlined_call_operand.vmem [shape: f32[32,1], index: 1, kind: input, shape index: {}]   ;;  %s1651_s2 = inlined_call_operand.vmem [shape: f32[32,64], index: 2, kind: input, shape index: {}]   ;;  %s1652_s3 = inlined_call_operand.vmem [shape: f32[1,64], index: 3, kind: input, shape index: {}]   ;;  %s1653_s4 = inlined_call_operand.vmem [shape: f32[64,32], index: 4, kind: input, shape index: {}]   ;;  %s1654_s5 = inlined_call_operand.vmem [shape: f32[1,32], index: 5, kind: input, shape index: {}]   ;;  %s1655_s6 = inlined_call_operand.vmem [shape: f32[32,64], index: 6, kind: input, shape index: {}]   ;;  %s1656_s7 = inlined_call_operand.vmem [shape: f32[1,64], index: 7, kind: input, shape index: {}]   ;;  %s1657_s8 = inlined_call_operand.vmem [shape: f32[64,32], index: 8, kind: input, shape index: {}]   ;;  %s1658_s9 = inlined_call_operand.vmem [shape: f32[1,32], index: 9, kind: input, shape index: {}]   ;;  %s1659_s10 = inlined_call_operand.hbm [shape: f32[32,32], index: 10, kind: output, shape index: {0}]   ;;  %s1660_s11 = inlined_call_operand.hbm [shape: f32[1,1], index: 11, kind: output, shape index: {1}]  }
   0x1   :  { %19 = vsyncpa [#allocation3 + $0x1], 0 }
   0x2   :  { %20 = vsyncpa [#allocation5], 0  ;;  %s1386_s17 = smov 0   ;;  %s1388_s18 = smov 0  }
   0x3   :  { %s1390_s19 = smov 0   ;;  %s1392_s20 = smov 0  }
   0x4 LB: > { %s1407_s21 = sadd.s32 4294967295, %s1318_s20   ;;  %s994_s22 = sadd.s32 4294967294, %s1318_s20   ;;  %s1318_s20 = sphi %s1392_s20, %s1668_s20   ;;  %s1314_s19 = sphi %s1390_s19, %s1667_s19   ;;  %s1310_s18 = sphi %s1388_s18, %s1666_s18   ;;  %s1306_s17 = sphi %s1386_s17, %s1665_s17  }
   0x5   : > { %s1411_s23 = sadd.s32 1, %s1318_s20   ;;  %s253_s24 = sadd.s32 1, %s1314_s19 }
   0x6   : > { %s250_s25 = ssub.s32 %s1318_s20, %s1411_s23  ;;  %p263_p0 = scmp.ne.s32.totalorder %s1314_s19, %s1310_s18 }
   0x7   : > { %p251_p1 = scmp.eq.s32.totalorder %s250_s25, 0  ;;  %p264_p2 = scmp.eq.s32.totalorder %s1407_s21, 1 }
   0x8   : > { %p269_p3 = scmp.ne.s32.totalorder %s1310_s18, %s1306_s17  ;;  %p270_p4 = scmp.eq.s32.totalorder %s994_s22, 1 }
   0x9   : > { %s1422_s26 = scalar_select %p251_p1, %s1314_s19, %s253_s24  }
   0xa   : > { %p1426_p5 = por %p264_p2, %p263_p0  ;;  %p1430_p6 = por %p270_p4, %p269_p3 }
   0xb   : > { %1661 = sst [smem:[#allocation8_spill]] %s1422_s26  ;;  %p997_p7 = scmp.ge.s32.totalorder %s1318_s20, 1 }
   0xc   : > { %p351_p8 = scmp.lt.s32.totalorder %s1318_s20, 3 }
   0xe   : > { %p352_p9 = pnand %p997_p7, %p351_p8 }
   0xf   : > { %v413_v0 = vld [vmem:[%s1651_s2] sm:$0xff] (!%p352_p9)  ;;  %v414_v1 = vld [vmem:[%s1651_s2 + $0x8] sm:$0xff] (!%p352_p9)  ;;  %v415_v2 = vld [vmem:[%s1651_s2 + $0x10] sm:$0xff] (!%p352_p9)  ;;  %s999_s16 = sshll.u32 (!%p352_p9), %s1407_s21, 1  ;;  %vm424_vm0 = vcmask (!%p352_p9), 261120   ;;  %v1320_v20 = vmov (!%p352_p9), 0  }
  0x10   : > { %355 = sbr.rel (%p352_p9) target bundleno = 1484 (0x5cc), region = 60  ;;  %v1117_v3 = vpack.c.bf16 (!%p352_p9), %v414_v1, %v413_v0  ;;  %v416_v4 = vld [vmem:[%s1651_s2 + $0x18] sm:$0xff] (!%p352_p9)  ;;  %p397_p10 = scmp.lt.s32.totalorder (!%p352_p9), %s999_s16, 3  ;;  %v508_v6 = vld [vmem:[%s1653_s4] sm:$0xff] (!%p352_p9)  ;;  %v509_v7 = vld [vmem:[%s1653_s4 + $0x8] sm:$0xff] (!%p352_p9)  ;;  %1217 = vset.pattern.permute.xlu0 (!%p352_p9), %v1320_v20  ;;  %vm523_vm1 = vcmask (!%p352_p9), 523264  }
  0x11   : > { %v1121_v5 = vpack.c.bf16 (!%p352_p9), %v416_v4, %v415_v2  ;;  %v1125_v8 = vpack.c.bf16 (!%p352_p9), %v509_v7, %v508_v6  ;;  %v510_v9 = vld [vmem:[%s1653_s4 + $0x10] sm:$0xff] (!%p352_p9)  ;;  %v511_v10 = vld [vmem:[%s1653_s4 + $0x18] sm:$0xff] (!%p352_p9)  ;;  %v512_v14 = vld [vmem:[%s1653_s4 + $0x20] sm:$0xff] (!%p352_p9)  ;;  %s391_s14 = sand.u32 (!%p352_p9), 1, %s1310_s18   ;;  %vm853_vm2 = vcmask (!%p352_p9), 7168   ;;  %p1015_p11 = scmp.ne.s32.totalorder (!%p352_p9), %s1407_s21, 0 }
  0x12   : > { %1118 = vmatprep.subr.bf16.mxu1 (!%p352_p9), %v1117_v3  ;;  %v1129_v13 = vpack.c.bf16 (!%p352_p9), %v511_v10, %v510_v9  ;;  %v513_v15 = vld [vmem:[%s1653_s4 + $0x28] sm:$0xff] (!%p352_p9)  ;;  %v514_v17 = vld [vmem:[%s1653_s4 + $0x30] sm:$0xff] (!%p352_p9)  ;;  %v515_v18 = vld [vmem:[%s1653_s4 + $0x38] sm:$0xff] (!%p352_p9) }
  0x13   : > { %1120 = vmatpush3.bf16.msra.mxu1 (!%p352_p9), %v1117_v3  ;;  %v1133_v16 = vpack.c.bf16 (!%p352_p9), %v513_v15, %v512_v14  ;;  %v1137_v19 = vpack.c.bf16 (!%p352_p9), %v515_v18, %v514_v17  ;;  %v619_v22 = vld [vmem:[%s1655_s6] sm:$0xff] (!%p352_p9)  ;;  %v620_v23 = vld [vmem:[%s1655_s6 + $0x8] sm:$0xff] (!%p352_p9)  ;;  %v621_v33 = vld [vmem:[%s1655_s6 + $0x10] sm:$0xff] (!%p352_p9) }
  0x14   : > { %1122 = vmatprep.subr.bf16.mxu1 (!%p352_p9), %v1121_v5  ;;  %v1141_v25 = vpack.c.bf16 (!%p352_p9), %v620_v23, %v619_v22  ;;  %v1003_v26 = vld [vmem:[%s1652_s3] ss:$0 sm:$0xff] (!%p352_p9)  ;;  %v622_v34 = vld [vmem:[%s1655_s6 + $0x18] sm:$0xff] (!%p352_p9)  ;;  %v714_v37 = vld [vmem:[%s1657_s8 + $0x8] sm:$0xff] (!%p352_p9) }
  0x15   : > { %v1145_v35 = vpack.c.bf16 (!%p352_p9), %v622_v34, %v621_v33  ;;  %v713_v36 = vld [vmem:[%s1657_s8] sm:$0xff] (!%p352_p9)  ;;  %v715_v45 = vld [vmem:[%s1657_s8 + $0x10] sm:$0xff] (!%p352_p9)  ;;  %v716_v46 = vld [vmem:[%s1657_s8 + $0x18] sm:$0xff] (!%p352_p9) }
  0x16   : > { %1142 = vmatprep.subr.bf16.mxu0 (!%p352_p9), %v1141_v25  ;;  %v1149_v38 = vpack.c.bf16 (!%p352_p9), %v714_v37, %v713_v36  ;;  %v1006_v40 = vld [vmem:[%s1654_s5] ss:$0 sm:$0xff] (!%p352_p9)  ;;  %v1153_v50 = vpack.c.bf16 (!%p352_p9), %v716_v46, %v715_v45  ;;  %v718_v52 = vld [vmem:[%s1657_s8 + $0x28] sm:$0xff] (!%p352_p9)  ;;  %v719_v54 = vld [vmem:[%s1657_s8 + $0x30] sm:$0xff] (!%p352_p9) }
  0x17   : > { %s1670_s16 = smov (!%p397_p10, %s999_s16), 3  ;;  %1124 = vmatpush3.bf16.msra.mxu1 %v1121_v5  ;;  %1144 = vmatpush3.bf16.msra.mxu0 %v1141_v25  ;;  %v717_v51 = vld [vmem:[%s1657_s8 + $0x20] sm:$0xff]  ;;  %v720_v55 = vld [vmem:[%s1657_s8 + $0x38] sm:$0xff]  ;;  %vm871_vm3 = vcmask (!%p1015_p11), 0  }
  0x18   : > { %s1000_s12 = sshll.u32 %s1670_s16, 3  ;;  %1126 = vmatprep.subr.bf16.mxu1 %v1125_v8  ;;  %1146 = vmatprep.subr.bf16.mxu0 %v1145_v35  ;;  %v1157_v53 = vpack.c.bf16 %v718_v52, %v717_v51  ;;  %v1161_v56 = vpack.c.bf16 %v720_v55, %v719_v54  ;;  %v1009_v59 = vld [vmem:[%s1656_s7] ss:$0 sm:$0xff] }
  0x19   : > { %s400_s15 = scalar_lea.vmem %s1649_s0, %s1000_s12  ;;  %s406_s16 = scalar_lea.vmem %s1650_s1, %s1000_s12  ;;  %v1012_v4 = vld [vmem:[%s1658_s9] ss:$0 sm:$0xff] }
  0x1a   : > { %v1467_v11 = vld [vmem:[%s400_s15] sm:$0xff]  ;;  %v1471_v12 = vld [vmem:[%s400_s15 + $0x8] sm:$0xff]  ;;  %s998_s12 = sshll.u32 %s391_s14, 4 }
  0x1b   : > { %1065 = vmatprep.mubr.msk.f32.mxu1 %vm424_vm0, %v1467_v11  ;;  %v1490_v21 = vld [vmem:[%s406_s16] sm:$0xff]  ;;  %v1499_v24 = vld [vmem:[%s406_s16 + $0x8] sm:$0xff]  ;;  %1148 = vmatpush3.bf16.msra.mxu0 %v1145_v35  ;;  %s1531_s29 = scalar_lea.vmem [#allocation2], %s998_s12  ;;  %v809_v57 = vmul.f32 %v1467_v11, %v1467_v11  ;;  %v810_v2 = vmul.f32 %v1471_v12, %v1471_v12 }
  0x1c   : > { %1066 = vmatmul.mubr.msk.f32.vlgmr.msra.gmra.mrb[0].mxu1 %vm424_vm0, %v1471_v12  ;;  %609 = vperm.xlu0 %1217, %v1490_v21  }
  0x1d   : > { %1128 = vmatpush3.bf16.msra.mxu1 %v1125_v8  ;;  %1150 = vmatprep.subr.bf16.mxu0 %v1149_v38  ;;  %v811_v58 = vsel %vm424_vm0, %v809_v57, 0.0  ;;  %v814_v3 = vsel %vm424_vm0, %v810_v2, 0.0 }
  0x1e   : > { %1130 = vmatprep.subr.bf16.mxu1 %v1129_v13  ;;  %812 = vadd.xlane.f32.xlu1 %v811_v58 }
  0x20   : > { %614 = vperm.xlu0 %1217, %v1499_v24  }
  0x21   : > { %1132 = vmatpush3.bf16.msra.mxu1 %v1129_v13 }
  0x22   : > { %1134 = vmatprep.subr.bf16.mxu1 %v1133_v16  ;;  %815 = vadd.xlane.f32.xlu1 %v814_v3 }
  0x25   : > { %1136 = vmatpush3.bf16.msra.mxu1 %v1133_v16 }
  0x26   : > { %1138 = vmatprep.subr.bf16.mxu1 %v1137_v19 }
  0x29   : > { %1140 = vmatpush3.bf16.msra.mxu1 %v1137_v19 }
  0x9b   : > { %v610_v39 = vpop.permute.xlu0 %609 }
  0x9f   : > { %v615_v47 = vpop.permute.xlu0 %614 }
  0xab   : > { %v813_v15 = vpop.xlane.xlu1 %812 }
  0xac   : > { %v817_v17 = vmax.f32 %v813_v15, 1e-24 }
  0xae   : > { %1218 = vrsqrt.f32 %v817_v17 }
  0xaf   : > { %v816_v16 = vpop.xlane.xlu1 %815 }
  0xb0   : > { %v818_v18 = vmax.f32 %v816_v16, 1e-24 }
  0xb2   : > { %1220 = vrsqrt.f32 %v818_v18 }
  0xb8   : > { %v1219_v25 = vpop.eup %1218 }
  0xef   : > { %v1067_v27 = vpop.f32.mrb[0].mxu1 }
  0xf0   : > { %v503_v28 = vadd.f32 %v1067_v27, %v1003_v26  ;;  %v497_v29 = vpop.f32.mrb[1].mxu1 }
  0xf1   : > { %v498_v30 = vadd.f32 %v1003_v26, %v497_v29  ;;  %v1221_v26 = vpop.eup %1220  ;;  %v833_v29 = vmul.f32 %v1219_v25, %v1467_v11  ;;  %v850_v11 = vsub.f32 1.0, %v1499_v24  ;;  %v1321_v24 = vmov (!%p1015_p11), 0.0  }
  0xf2   : > { %v507_v32 = vmax.f32 %v503_v28, 0.0  ;;  %872 = vst.msk [vmem:[#allocation4] sm:$0x1] (!%p1015_p11), %vm871_vm3, %v1321_v24 }
  0xf3   : > { %v506_v31 = vmax.f32 %v498_v30, 0.0 }
  0xf5   : > { %1084 = vmatprep.mubr.msk.f32.mxu1 %vm523_vm1, %v506_v31  ;;  %v834_v31 = vmul.f32 %v1221_v26, %v1471_v12 }
  0xf6   : > { %1085 = vmatmul.mubr.msk.f32.vlgmr.msra.gmra.mrb[2].mxu1 %vm523_vm1, %v507_v32 }
 0x1c9   : > { %v1086_v41 = vpop.f32.mrb[2].mxu1 }
 0x1ca   : > { %v602_v42 = vadd.f32 %v1086_v41, %v1006_v40  ;;  %v596_v43 = vpop.f32.mrb[3].mxu1 }
 0x1cb   : > { %v597_v44 = vadd.f32 %v1006_v40, %v596_v43 }
 0x1cc   : > { %606 = vst.msk [vmem:[%s1531_s29 + $0x8] sm:$0xff] %vm424_vm0, %v602_v42  ;;  %v618_v49 = vmul.f32 %v615_v47, %v602_v42 }
 0x1cd   : > { %605 = vst.msk [vmem:[%s1531_s29] sm:$0xff] %vm424_vm0, %v597_v44  ;;  %v617_v48 = vmul.f32 %v610_v39, %v597_v44  ;;  %v849_v39 = vsub.f32 1.0, %v1490_v21 }
 0x1cf   : > { %1095 = vmatprep.mubr.msk.f32.mxu0 %vm424_vm0, %v617_v48 }
 0x1d0   : > { %1096 = vmatmul.mubr.msk.f32.vlgmr.msra.gmra.mrb[0].mxu0 %vm424_vm0, %v618_v49 }
 0x1d1   : > { %1152 = vmatpush3.bf16.msra.mxu0 %v1149_v38 }
 0x1d2   : > { %1154 = vmatprep.subr.bf16.mxu0 %v1153_v50 }
 0x1d5   : > { %1156 = vmatpush3.bf16.msra.mxu0 %v1153_v50 }
 0x1d6   : > { %1158 = vmatprep.subr.bf16.mxu0 %v1157_v53 }
 0x1d9   : > { %1160 = vmatpush3.bf16.msra.mxu0 %v1157_v53 }
 0x1da   : > { %1162 = vmatprep.subr.bf16.mxu0 %v1161_v56 }
 0x1dd   : > { %1164 = vmatpush3.bf16.msra.mxu0 %v1161_v56 }
 0x2a3   : > { %v1097_v60 = vpop.f32.mrb[0].mxu0 }
 0x2a4   : > { %v708_v61 = vadd.f32 %v1097_v60, %v1009_v59  ;;  %v702_v62 = vpop.f32.mrb[1].mxu0 }
 0x2a5   : > { %v703_v63 = vadd.f32 %v1009_v59, %v702_v62 }
 0x2a6   : > { %v712_v1 = vmax.f32 %v708_v61, 0.0 }
 0x2a7   : > { %v711_v0 = vmax.f32 %v703_v63, 0.0 }
 0x2a9   : > { %1114 = vmatprep.mubr.msk.f32.mxu0 %vm523_vm1, %v711_v0 }
 0x2aa   : > { %1115 = vmatmul.mubr.msk.f32.vlgmr.msra.gmra.mrb[2].mxu0 %vm523_vm1, %v712_v1 }
 0x37d   : > { %v1116_v5 = vpop.f32.mrb[2].mxu0 }
 0x37e   : > { %v806_v6 = vadd.f32 %v1116_v5, %v1012_v4  ;;  %v800_v7 = vpop.f32.mrb[3].mxu0 }
 0x37f   : > { %v801_v8 = vadd.f32 %v1012_v4, %v800_v7 }
 0x380   : > { %v822_v9 = vmul.f32 %v806_v6, %v806_v6 }
 0x381   : > { %v821_v10 = vmul.f32 %v801_v8, %v801_v8 }
 0x382   : > { %v826_v13 = vsel %vm424_vm0, %v822_v9, 0.0 }
 0x383   : > { %827 = vadd.xlane.f32.xlu1 %v826_v13  ;;  %v823_v14 = vsel %vm424_vm0, %v821_v10, 0.0 }
 0x384   : > { %824 = vadd.xlane.f32.xlu0 %v823_v14 }
 0x410   : > { %v828_v19 = vpop.xlane.xlu1 %827 }
 0x411   : > { %v830_v20 = vmax.f32 %v828_v19, 1e-24  ;;  %v825_v22 = vpop.xlane.xlu0 %824 }
 0x412   : > { %v829_v23 = vmax.f32 %v825_v22, 1e-24 }
 0x413   : > { %1222 = vrsqrt.f32 %v830_v20 }
 0x414   : > { %1224 = vrsqrt.f32 %v829_v23 }
 0x41d   : > { %v1223_v27 = vpop.eup %1222 }
 0x41e   : > { %v1225_v28 = vpop.eup %1224  ;;  %v836_v32 = vmul.f32 %v1223_v27, %v806_v6 }
 0x41f   : > { %v835_v30 = vmul.f32 %v1225_v28, %v801_v8 }
 0x420   : > { %v838_v35 = vmul.f32 %v836_v32, %v834_v31 }
 0x421   : > { %v837_v33 = vmul.f32 %v835_v30, %v833_v29 }
 0x422   : > { %v842_v36 = vsel %vm424_vm0, %v838_v35, 0.0 }
 0x423   : > { %v839_v34 = vsel %vm424_vm0, %v837_v33, 0.0 }
 0x424   : > { %840 = vadd.xlane.f32.xlu1 %v839_v34 }
 0x428   : > { %843 = vadd.xlane.f32.xlu1 %v842_v36 }
 0x4b1   : > { %v841_v37 = vpop.xlane.xlu1 %840 }
 0x4b2   : > { %v845_v38 = vsub.f32 1.0, %v841_v37 }
 0x4b4   : > { %v847_v40 = vmul.f32 %v845_v38, %v845_v38 }
 0x4b5   : > { %v844_v41 = vpop.xlane.xlu1 %843 }
 0x4b6   : > { %v846_v42 = vsub.f32 1.0, %v844_v41  ;;  %v851_v43 = vmul.f32 %v849_v39, %v847_v40 }
 0x4b8   : > { %v848_v12 = vmul.f32 %v846_v42, %v846_v42  ;;  %v854_v45 = vsel %vm853_vm2, %v851_v43, 0.0 }
 0x4ba   : > { %v852_v44 = vmul.f32 %v850_v11, %v848_v12 }
 0x4bc   : > { %v855_v46 = vsel %vm853_vm2, %v852_v44, 0.0 }
 0x4bd   : > { %v856_v47 = vadd.f32 %v855_v46, %v854_v45 }
 0x4bf   : > { %857 = vadd.xlane.f32.xlu1 %v856_v47 }
 0x54c   : > { %v858_v48 = vpop.xlane.xlu1 %857 }
 0x54d   : > { %v859_v49 = vrot.slane %v858_v48, 4 }
 0x54f   : > { %v860_v50 = vadd.f32 %v859_v49, %v858_v48 }
 0x551   : > { %v861_v51 = vrot.slane %v860_v50, 2 }
 0x553   : > { %v862_v52 = vadd.f32 %v861_v51, %v860_v50 }
 0x555   : > { %v863_v53 = vrot.slane %v862_v52, 1 }
 0x557   : > { %v864_v21 = vadd.f32 %v863_v53, %v862_v52 }
 0x559   : > { %1165 = vpush %v864_v21 }
 0x585   : > { %870 = sbr.rel (%p1015_p11) target bundleno = 1420 (0x58c), region = 64 }
 0x58a   : > { %s1166_s22 = spop %1165 }
 0x58b   : > { %v866_v54 = vstv %s1166_s22 }
 0x58c PF: > { %v873_v55 = vld [vmem:[#allocation4] sm:$0x1]  ;;  %vm875_vm4 = vcmask 0   ;;  %p1016_p12 = scmp.ne.s32.totalorder %s1407_s21, 1 }
 0x58d   : > { %v874_v56 = vadd.f32 %v873_v55, %v866_v54 }
 0x58e   : > { %880 = sbr.rel (%p1016_p12) target bundleno = 1434 (0x59a), region = 68 }
 0x58f   : > { %876 = vst.msk [vmem:[#allocation4] sm:$0x1] %vm875_vm4, %v874_v56 }
 0x596   : > { %v881_v57 = vld [vmem:[#allocation4] sm:$0x1] }
 0x597   : > { %v882_v58 = vmul.f32 0.0625, %v881_v57 }
 0x599   : > { %883 = vst.msk [vmem:[#allocation4] sm:$0x1] %vm875_vm4, %v882_v58 }
 0x59a PF: > { %s1024_s12 = sshll.u32 %s1407_s21, 8  ;;  %s898_s16 = sshll.u32 %s1531_s29, 4  ;;  %s1582_s16 = int_to_ptr.vmem [resolvable:$true] %s898_s16 }
 0x59b   : > { %s1579_s26 = scalar_lea.hbm %s1659_s10, %s1024_s12  ;;  %s1586_s30 = scalar_lea.sflag [#allocation3], %s391_s14 }
 0x59c   : > { %s1226_s13 = scalar_lea.vmem %s1582_s16, 256  ;;  %s1322_s15 = smov [#allocation2]  }
 0x59d   : > { %p1227_p13 = scmp.ne.s32.totalorder %s1582_s16, %s1226_s13  ;;  %s1230_s22 = sshll.u32 %s1322_s15, 4  ;;  %s1231_s22 = int_to_ptr.vmem [resolvable:$false] %s1230_s22 }
 0x59e   : > { %s1232_s24 = scalar_lea.vmem %s1231_s22, 512  ;;  %p1233_p3 = scmp.lt.s32.totalorder %s1582_s16, %s1231_s22 }
 0x59f   : > { %p1228_p0 = pnand %p1227_p13, %p1426_p5  ;;  %p1234_p4 = scmp.lt.s32.totalorder %s1232_s24, %s1226_s13 }
 0x5a1   : > { %p1229_p1 = pneg %p1228_p0  ;;  %p1235_p7 = por %p1234_p4, %p1233_p3 }
 0x5a3   : > { %p1236_p8 = pnand %p1235_p7, %p1229_p1 }
 0x5a5   : > { %1239 = shalt.err (!%p1236_p8)
}
 0x5a6   : > { %s1240_s14 = scalar_lea.hbm %s1579_s26, 256  ;;  %s1244_s25 = scalar_lea.hbm %s1659_s10, 512 }
 0x5a7   : > { %p1241_p9 = scmp.ne.s32.totalorder %s1579_s26, %s1240_s14  ;;  %p1245_p12 = scmp.lt.u32.totalorder %s1579_s26, %s1659_s10 }
 0x5a8   : > { %p1246_p13 = scmp.lt.u32.totalorder %s1244_s25, %s1240_s14  ;;  %p1248_p1 = scmp.lt.u32.totalorder %s1240_s14, %s1579_s26 }
 0x5a9   : > { %p1242_p10 = pnand %p1241_p9, %p1426_p5 }
 0x5aa   : > { %p1247_p0 = por %p1246_p13, %p1245_p12 }
 0x5ab   : > { %p1243_p11 = pneg %p1242_p10 }
 0x5ac   : > { %p1249_p3 = por %p1248_p1, %p1247_p0 }
 0x5ae   : > { %p1250_p4 = pnand %p1249_p3, %p1243_p11 }
 0x5b0   : > { %1253 = shalt.err (!%p1250_p4)
}
 0x5b1   : > { %s1323_s13 = smov 128   ;;  %s1324_s24 = smov 8  }
 0x5b2   : > { %1167 = dma.vmem_to_hbm [thread:$0]  (%p1426_p5), %s1582_s16, 256, %s1579_s26, %s1586_s30, %s1323_s13, %s1323_s13, %s1324_s24  }
 0x5b3   : > { %s1325_s29 = smov [#allocation4]  }
 0x5b4   : > { %s912_s12 = sshll.u32 %s1325_s29, 4  ;;  %s913_s12 = int_to_ptr.vmem [resolvable:$true] %s912_s12 }
 0x5b5   : > { %s1254_s15 = scalar_lea.vmem %s913_s12, 16  ;;  %s1260_s14 = scalar_lea.vmem %s913_s12, 32 }
 0x5b6   : > { %p1255_p7 = scmp.ne.s32.totalorder %s913_s12, %s1254_s15  ;;  %p1261_p10 = scmp.lt.s32.totalorder %s913_s12, %s913_s12 }
 0x5b7   : > { %p1262_p11 = scmp.lt.s32.totalorder %s1260_s14, %s1254_s15 }
 0x5b8   : > { %p1256_p8 = pnand %p1255_p7, %p264_p2 }
 0x5b9   : > { %p1263_p12 = por %p1262_p11, %p1261_p10 }
 0x5ba   : > { %p1257_p9 = pneg %p1256_p8 }
 0x5bc   : > { %p1264_p13 = pnand %p1263_p12, %p1257_p9 }
 0x5be   : > { %1267 = shalt.err (!%p1264_p13)
}
 0x5bf   : > { %s1268_s27 = scalar_lea.hbm %s1660_s11, 16 }
 0x5c0   : > { %p1269_p5 = scmp.ne.s32.totalorder %s1660_s11, %s1268_s27  ;;  %p1274_p3 = scmp.lt.u32.totalorder %s1268_s27, %s1660_s11 }
 0x5c2   : > { %p1270_p0 = pnand %p1269_p5, %p264_p2 }
 0x5c4   : > { %p1271_p1 = pneg %p1270_p0 }
 0x5c6   : > { %p1276_p4 = pnand %p1274_p3, %p1271_p1 }
 0x5c8   : > { %1279 = shalt.err (!%p1276_p4)
}
 0x5c9   : > { %1169 = dma.vmem_to_hbm [thread:$0]  (%p264_p2), %s913_s12, 16, %s1660_s11, [#allocation5]  }
 0x5ca   : > { %1297 = dma.done.wait (%p264_p2), [#allocation5], 16  }
 0x5cb   : > { %1299 = vsyncadd (%p264_p2), [#allocation5], 4294967280 }
 0x5cc PF: > { %p1179_p7 = scmp.ge.s32.totalorder %s1318_s20, 2  ;;  %s928_s15 = sand.u32 1, %s1306_s17  }
 0x5cd   : > { %s929_s14 = scalar_lea.sflag [#allocation3], %s928_s15 }
 0x5ce   : > { %p1174_p8 = pnand %p1179_p7, %p1430_p6 }
 0x5d0   : > { %1301 = dma.done.wait (!%p1174_p8), %s929_s14, 256  }
 0x5d1   : > { %1303 = vsyncadd (!%p1174_p8), %s929_s14, 4294967040  ;;  %s1664_s12 = sld [smem:[#allocation8_spill]]  ;;  %p23_p9 = scmp.ge.s32.totalorder %s1411_s23, 4  }
 0x5d2   : > { %s1665_s17 = smov %s1310_s18  ;;  %s1666_s18 = smov %s1314_s19 }
 0x5d3   : > { %s1668_s20 = smov %s1411_s23  ;;  %25 = sbr.rel (!%p23_p9) target bundleno = 4 (0x4), region = 114 }
 0x5d7   : > { %s1667_s19 = smov %s1664_s12 }
 0x5da   :  { %934 = vsyncpa [#allocation3], 1 }
 0x5db   :  { %936 = vsyncpa [#allocation3 + $0x1], 1 }
 0x5dc   :  { %937 = vsyncpa [#allocation5], 1 }

</bundles_post_ra>
